<compile_context>
chip_gen: v7x
topology: tpu7x:2x2x1
jax: 0.10.0
libtpu: 0.0.40
codegen_flags: <defaults>
</compile_context>

<pallas_src>
import numpy as np
import jax
import jax.numpy as jnp
from jax import lax
from jax.experimental import pallas as pl
from jax.experimental.pallas import tpu as pltpu

BIG = 1.0e9        # finite surrogate for float('Inf') in the padded score matrix
INF_FILL = 1.0e30  # "infinity" fill for shifts / prefix-min (finite -> no Inf-Inf NaNs)
DN_I, DN_J = 1, 1  # do_nothing_ij = np.array([1, 1])
B_TILE = 8         # f32 sublane count: batch rows packed onto the sublane axis


# --------------------------------- kernel ---------------------------------
def matching_kernel(xl_ref, yl_ref, c_ref, ins_ref, del_ref, out_ref):
    # Per grid step:
    #   xl_ref, yl_ref : (B_TILE, 1)     int32  effective lengths - 1
    #   c_ref          : (B_TILE, Lx, Ly) f32   C[b,i,j] = score[xs_i, ys_j]
    #   ins_ref        : (B_TILE, Ly)    f32    score[DN_I, ys_j]
    #   del_ref        : (B_TILE, Lx)    f32    score[xs_i, DN_J]
    #   out_ref        : (B_TILE, 1)     f32    per-batch-element loss
    Bt, Lx, Ly = c_ref.shape
    Lyp1 = Ly + 1

    xl = xl_ref[...]
    yl = yl_ref[...]
    ins = ins_ref[...]
    dele = del_ref[...]

    # Hoisted constants (broadcast_in_dim is not CSE'd by JAX -> build once).
    lane = lax.broadcasted_iota(jnp.int32, (Bt, Lyp1), 1)
    shifts = []
    s = 1
    while s < Lyp1:
        shifts.append(s)
        s *= 2
    zero_fill = {s: jnp.zeros((Bt, s), jnp.float32) for s in shifts}
    inf_fill = {s: jnp.full((Bt, s), INF_FILL, jnp.float32)
                for s in set(shifts) | {1}}
    zcol = jnp.zeros((Bt, 1), jnp.float32)
    icol = inf_fill[1]

    # TODO(synk): pltpu.roll(+mask) was considered for these shifts, but the DP
    # row is far narrower than 128 lanes; static slice+concat lowers robustly.
    def shift_right(v, s, fill_slab):
        return jnp.concatenate([fill_slab, v[:, : Lyp1 - s]], axis=-1)

    def prefix_sum(v):
        for s in shifts:
            v = v + shift_right(v, s, zero_fill[s])
        return v

    def prefix_min(v):
        for s in shifts:
            v = jnp.minimum(v, shift_right(v, s, inf_fill[s]))
        return v

    # D[0, :] (pure skip-y chain), one row per batch element.
    s_ins = prefix_sum(jnp.concatenate([zcol, ins], axis=-1))        # (Bt, Lyp1)

    d_row = s_ins
    result_row = d_row                         # correct answer when x_len-1 == 0

    # Unrolled row recursion of the alignment DP (Lx is small & static).
    for i in range(Lx):
        c_row = jnp.concatenate([icol, c_ref[:, i, :]], axis=-1)     # (Bt, Lyp1)
        del_i = dele[:, i:i + 1]                                     # (Bt, 1)
        d_shift = shift_right(d_row, 1, icol)                        # D[i, j-1]
        # E[j] = min(D[i,j-1] + sub(i,j), D[i,j] + skip_x(i)); j==0 -> boundary
        f = jnp.minimum(d_shift + c_row, d_row + del_i)
        # D[i+1, j] = min_{k<=j} (F[k] + Sins[j] - Sins[k])   (skip-y chain)
        d_row = s_ins + prefix_min(f - s_ins)
        # VPU select only; the XLU lane reduction is hoisted out of the loop.
        result_row = jnp.where(xl == i + 1, d_row, result_row)

    # Single masked lane reduction: pick column j = y_len-1 per batch row.
    out_ref[...] = jnp.sum(jnp.where(lane == yl, result_row, 0.0),
                           axis=-1, keepdims=True)


# ------------------------------ JAX wrapper -------------------------------
def init_matching_params(key, S, A):
    # mirrors torch: P = softmax(rand(S, A), dim=1), deterministic via PRNGKey
    u = jax.random.uniform(key, (S, A), dtype=jnp.float32)
    return jax.nn.softmax(u, axis=1)


def build_score(P):
    # F.pad(1 - softmax(P, dim=1), (0,1,0,1), value=Inf) with Inf -> BIG
    score = 1.0 - jax.nn.softmax(P, axis=1)
    return jnp.pad(score, ((0, 1), (0, 1)), constant_values=BIG)


@jax.jit
def matching_model_forward(P, xs, ys, x_lengths, y_lengths):
    S, A = P.shape
    B, Lx = xs.shape
    _, Ly = ys.shape

    score_pad = build_score(P)                                   # (S+1, A+1)

    # Batched gather-as-matmul in the wrapper (fused by XLA; one-hots never hit
    # the pallas_call boundary).  HIGHEST precision keeps the selected score
    # values exact (each one-hot contraction picks a single matrix element).
    x_oh = jax.nn.one_hot(xs, S + 1, dtype=jnp.float32)          # (B, Lx, S+1)
    y_oh = jax.nn.one_hot(ys, A + 1, dtype=jnp.float32)          # (B, Ly, A+1)
    hp = lax.Precision.HIGHEST
    C = jnp.einsum('bls,sa,bma->blm', x_oh, score_pad, y_oh, precision=hp)
    ins = jnp.einsum('a,bma->bm', score_pad[DN_I], y_oh, precision=hp)
    dele = jnp.einsum('bls,s->bl', x_oh, score_pad[:, DN_J], precision=hp)

    xl = (x_lengths - 1).astype(jnp.int32).reshape(B, 1)
    yl = (y_lengths - 1).astype(jnp.int32).reshape(B, 1)

    # Pad the batch to a multiple of B_TILE so the kernel runs on full sublanes.
    Bp = ((B + B_TILE - 1) // B_TILE) * B_TILE
    pad = Bp - B
    if pad:
        C = jnp.pad(C, ((0, pad), (0, 0), (0, 0)))
        ins = jnp.pad(ins, ((0, pad), (0, 0)))
        dele = jnp.pad(dele, ((0, pad), (0, 0)))
        xl = jnp.pad(xl, ((0, pad), (0, 0)))
        yl = jnp.pad(yl, ((0, pad), (0, 0)))

    # VMEM per grid step (double-buffered inputs) ~= 2*4*B_TILE*(Lx*Ly+Lx+Ly+3)
    # bytes -- trivial here.  If scaled up, shrink B_TILE first and budget
    # against v7x's 64 MiB (32 MiB scoped default) via vmem_limit_bytes.
    num_tiles = Bp // B_TILE
    losses = pl.pallas_call(
        matching_kernel,
        out_shape=jax.ShapeDtypeStruct((Bp, 1), jnp.float32),
        grid_spec=pltpu.PrefetchScalarGridSpec(
            num_scalar_prefetch=0,
            grid=(num_tiles,),
            in_specs=[
                pl.BlockSpec((B_TILE, 1), lambda g: (g, 0)),          # xl
                pl.BlockSpec((B_TILE, 1), lambda g: (g, 0)),          # yl
                pl.BlockSpec((B_TILE, Lx, Ly), lambda g: (g, 0, 0)),  # C
                pl.BlockSpec((B_TILE, Ly), lambda g: (g, 0)),         # ins
                pl.BlockSpec((B_TILE, Lx), lambda g: (g, 0)),         # del
            ],
            out_specs=pl.BlockSpec((B_TILE, 1), lambda g: (g, 0)),
        ),
        # Each grid step owns its own output block -> batch axis is megacore-safe.
        compiler_params=pltpu.CompilerParams(
            dimension_semantics=("parallel",)),
    )(xl, yl, C, ins, dele)

    # TODO(synk): batch reduction convention (mean) assumed for matching_loss_batch.
    return jnp.mean(losses[:B, 0])


# --------------------------- pure-numpy reference --------------------------
def _reference_loss(score_pad, xs, ys, x_lengths, y_lengths):
    sp = np.asarray(score_pad, dtype=np.float64)
    B, Lx = xs.shape
    _, Ly = ys.shape
    losses = []
    for b in range(B):
        xl = int(x_lengths[b]) - 1
        yl = int(y_lengths[b]) - 1
        D = np.zeros((Lx + 1, Ly + 1), dtype=np.float64)
        for j in range(1, Ly + 1):
            D[0, j] = D[0, j - 1] + sp[DN_I, ys[b, j - 1]]
        for i in range(1, Lx + 1):
            D[i, 0] = D[i - 1, 0] + sp[xs[b, i - 1], DN_J]
            for j in range(1, Ly + 1):
                D[i, j] = min(
                    D[i - 1, j - 1] + sp[xs[b, i - 1], ys[b, j - 1]],
                    D[i - 1, j] + sp[xs[b, i - 1], DN_J],
                    D[i, j - 1] + sp[DN_I, ys[b, j - 1]],
                )
        losses.append(D[xl, yl])
    return float(np.mean(losses))


# ----------------------------------- main ----------------------------------
if __name__ == "__main__":
    S, A = 4, 6          # sprites, alphabet
    B, Lx, Ly = 2, 8, 8  # batch, max sprite-seq len, max char-seq len

    key = jax.random.PRNGKey(0)
    kp, kx, ky, klx, kly = jax.random.split(key, 5)

    P = init_matching_params(kp, S, A)

    x_lengths = jax.random.randint(klx, (B,), 2, Lx + 1)
    y_lengths = jax.random.randint(kly, (B,), 2, Ly + 1)

    xs = jax.random.randint(kx, (B, Lx), 0, S)
    ys = jax.random.randint(ky, (B, Ly), 0, A)
    # pad tails (positions >= length) with the "Inf"-row indices S / A
    tx = jnp.arange(Lx)[None, :]
    ty = jnp.arange(Ly)[None, :]
    xs = jnp.where(tx < x_lengths[:, None], xs, S).astype(jnp.int32)
    ys = jnp.where(ty < y_lengths[:, None], ys, A).astype(jnp.int32)

    loss = matching_model_forward(P, xs, ys, x_lengths, y_lengths)
    loss = jax.block_until_ready(loss)

    ref = _reference_loss(np.asarray(build_score(P)), np.asarray(xs),
                          np.asarray(ys), np.asarray(x_lengths),
                          np.asarray(y_lengths))
    assert np.isfinite(float(loss)), loss
    assert abs(float(loss) - ref) < 1e-3, (float(loss), ref)
    print("KERNEL_OK")
</pallas_src>

<mosaic_0001>
module attributes {stable_mosaic.version = 11 : i64} {
  func.func @matching_kernel(%arg0: i32, %arg1: memref<8x1xi32, #tpu.memory_space<vmem>>, %arg2: memref<8x1xi32, #tpu.memory_space<vmem>>, %arg3: memref<8x8x8xf32, #tpu.memory_space<vmem>>, %arg4: memref<8x8xf32, #tpu.memory_space<vmem>>, %arg5: memref<8x8xf32, #tpu.memory_space<vmem>>, %arg6: memref<8x1xf32, #tpu.memory_space<vmem>>) attributes {dimension_semantics = [#tpu.dimension_semantics<parallel>], iteration_bounds = array<i64: 1>, scalar_prefetch = 0 : i64, scratch_operands = 0 : i64, tpu.core_type = #tpu.core_type<tc>, window_params = [{transform_indices = @transform_0, window_bounds = array<i64: 8, 1>}, {transform_indices = @transform_1, window_bounds = array<i64: 8, 1>}, {transform_indices = @transform_2, window_bounds = array<i64: 8, 8, 8>}, {transform_indices = @transform_3, window_bounds = array<i64: 8, 8>}, {transform_indices = @transform_4, window_bounds = array<i64: 8, 8>}, {transform_indices = @transform_5, window_bounds = array<i64: 8, 1>}]} {
    %c0 = arith.constant 0 : index
    %c0_0 = arith.constant 0 : index
    %0 = vector.load %arg1[%c0, %c0_0] : memref<8x1xi32, #tpu.memory_space<vmem>>, vector<8x1xi32>
    %c0_1 = arith.constant 0 : index
    %c0_2 = arith.constant 0 : index
    %1 = vector.load %arg2[%c0_1, %c0_2] : memref<8x1xi32, #tpu.memory_space<vmem>>, vector<8x1xi32>
    %c0_3 = arith.constant 0 : index
    %c0_4 = arith.constant 0 : index
    %2 = vector.load %arg4[%c0_3, %c0_4] : memref<8x8xf32, #tpu.memory_space<vmem>>, vector<8x8xf32>
    %c0_5 = arith.constant 0 : index
    %c0_6 = arith.constant 0 : index
    %3 = vector.load %arg5[%c0_5, %c0_6] : memref<8x8xf32, #tpu.memory_space<vmem>>, vector<8x8xf32>
    %4 = tpu.iota {dimensions = array<i32: 1>} : vector<8x9xi32>
    %cst = arith.constant 0.000000e+00 : f32
    %5 = vector.broadcast %cst : f32 to vector<8x1xf32>
    %cst_7 = arith.constant 0.000000e+00 : f32
    %6 = vector.broadcast %cst_7 : f32 to vector<8x2xf32>
    %cst_8 = arith.constant 0.000000e+00 : f32
    %7 = vector.broadcast %cst_8 : f32 to vector<8x4xf32>
    %cst_9 = arith.constant 0.000000e+00 : f32
    %8 = vector.broadcast %cst_9 : f32 to vector<8x8xf32>
    %cst_10 = arith.constant 1.000000e+30 : f32
    %9 = vector.broadcast %cst_10 : f32 to vector<8x1xf32>
    %cst_11 = arith.constant 1.000000e+30 : f32
    %10 = vector.broadcast %cst_11 : f32 to vector<8x2xf32>
    %cst_12 = arith.constant 1.000000e+30 : f32
    %11 = vector.broadcast %cst_12 : f32 to vector<8x4xf32>
    %cst_13 = arith.constant 1.000000e+30 : f32
    %12 = vector.broadcast %cst_13 : f32 to vector<8x8xf32>
    %cst_14 = arith.constant 0.000000e+00 : f32
    %13 = vector.broadcast %cst_14 : f32 to vector<8x1xf32>
    %14 = tpu.concatenate %13, %2 in 1 : vector<8x1xf32>, vector<8x8xf32> -> vector<8x9xf32>
    %15 = vector.extract_strided_slice %14 {offsets = [0, 0], sizes = [8, 8], strides = [1, 1]} : vector<8x9xf32> to vector<8x8xf32>
    %16 = tpu.concatenate %5, %15 in 1 : vector<8x1xf32>, vector<8x8xf32> -> vector<8x9xf32>
    %17 = arith.addf %14, %16 : vector<8x9xf32>
    %18 = vector.extract_strided_slice %17 {offsets = [0, 0], sizes = [8, 7], strides = [1, 1]} : vector<8x9xf32> to vector<8x7xf32>
    %19 = tpu.concatenate %6, %18 in 1 : vector<8x2xf32>, vector<8x7xf32> -> vector<8x9xf32>
    %20 = arith.addf %17, %19 : vector<8x9xf32>
    %21 = vector.extract_strided_slice %20 {offsets = [0, 0], sizes = [8, 5], strides = [1, 1]} : vector<8x9xf32> to vector<8x5xf32>
    %22 = tpu.concatenate %7, %21 in 1 : vector<8x4xf32>, vector<8x5xf32> -> vector<8x9xf32>
    %23 = arith.addf %20, %22 : vector<8x9xf32>
    %24 = vector.extract_strided_slice %23 {offsets = [0, 0], sizes = [8, 1], strides = [1, 1]} : vector<8x9xf32> to vector<8x1xf32>
    %25 = tpu.concatenate %8, %24 in 1 : vector<8x8xf32>, vector<8x1xf32> -> vector<8x9xf32>
    %26 = arith.addf %23, %25 : vector<8x9xf32>
    %c0_15 = arith.constant 0 : index
    %c0_16 = arith.constant 0 : index
    %c0_17 = arith.constant 0 : index
    %27 = vector.load %arg3[%c0_15, %c0_16, %c0_17] : memref<8x8x8xf32, #tpu.memory_space<vmem>>, vector<8x1x8xf32>
    %28 = vector.shape_cast %27 : vector<8x1x8xf32> to vector<8x8xf32>
    %29 = tpu.concatenate %9, %28 in 1 : vector<8x1xf32>, vector<8x8xf32> -> vector<8x9xf32>
    %30 = vector.extract_strided_slice %3 {offsets = [0, 0], sizes = [8, 1], strides = [1, 1]} : vector<8x8xf32> to vector<8x1xf32>
    %31 = vector.extract_strided_slice %26 {offsets = [0, 0], sizes = [8, 8], strides = [1, 1]} : vector<8x9xf32> to vector<8x8xf32>
    %32 = tpu.concatenate %9, %31 in 1 : vector<8x1xf32>, vector<8x8xf32> -> vector<8x9xf32>
    %33 = arith.addf %32, %29 : vector<8x9xf32>
    %34 = vector.broadcast %30 : vector<8x1xf32> to vector<8x9xf32>
    %35 = arith.addf %26, %34 : vector<8x9xf32>
    %36 = arith.minimumf %33, %35 : vector<8x9xf32>
    %37 = arith.subf %36, %26 : vector<8x9xf32>
    %38 = vector.extract_strided_slice %37 {offsets = [0, 0], sizes = [8, 8], strides = [1, 1]} : vector<8x9xf32> to vector<8x8xf32>
    %39 = tpu.concatenate %9, %38 in 1 : vector<8x1xf32>, vector<8x8xf32> -> vector<8x9xf32>
    %40 = arith.minimumf %37, %39 : vector<8x9xf32>
    %41 = vector.extract_strided_slice %40 {offsets = [0, 0], sizes = [8, 7], strides = [1, 1]} : vector<8x9xf32> to vector<8x7xf32>
    %42 = tpu.concatenate %10, %41 in 1 : vector<8x2xf32>, vector<8x7xf32> -> vector<8x9xf32>
    %43 = arith.minimumf %40, %42 : vector<8x9xf32>
    %44 = vector.extract_strided_slice %43 {offsets = [0, 0], sizes = [8, 5], strides = [1, 1]} : vector<8x9xf32> to vector<8x5xf32>
    %45 = tpu.concatenate %11, %44 in 1 : vector<8x4xf32>, vector<8x5xf32> -> vector<8x9xf32>
    %46 = arith.minimumf %43, %45 : vector<8x9xf32>
    %47 = vector.extract_strided_slice %46 {offsets = [0, 0], sizes = [8, 1], strides = [1, 1]} : vector<8x9xf32> to vector<8x1xf32>
    %48 = tpu.concatenate %12, %47 in 1 : vector<8x8xf32>, vector<8x1xf32> -> vector<8x9xf32>
    %49 = arith.minimumf %46, %48 : vector<8x9xf32>
    %50 = arith.addf %26, %49 : vector<8x9xf32>
    %c1_i32 = arith.constant 1 : i32
    %51 = vector.broadcast %c1_i32 : i32 to vector<8x1xi32>
    %52 = arith.cmpi eq, %0, %51 : vector<8x1xi32>
    %53 = vector.shape_cast %52 : vector<8x1xi1> to vector<8x1xi1>
    %54 = vector.broadcast %53 : vector<8x1xi1> to vector<8x9xi1>
    %55 = arith.select %54, %50, %26 : vector<8x9xi1>, vector<8x9xf32>
    %c0_18 = arith.constant 0 : index
    %c1 = arith.constant 1 : index
    %c0_19 = arith.constant 0 : index
    %56 = vector.load %arg3[%c0_18, %c1, %c0_19] : memref<8x8x8xf32, #tpu.memory_space<vmem>>, vector<8x1x8xf32>
    %57 = vector.shape_cast %56 : vector<8x1x8xf32> to vector<8x8xf32>
    %58 = tpu.concatenate %9, %57 in 1 : vector<8x1xf32>, vector<8x8xf32> -> vector<8x9xf32>
    %59 = vector.extract_strided_slice %3 {offsets = [0, 1], sizes = [8, 1], strides = [1, 1]} : vector<8x8xf32> to vector<8x1xf32>
    %60 = vector.extract_strided_slice %50 {offsets = [0, 0], sizes = [8, 8], strides = [1, 1]} : vector<8x9xf32> to vector<8x8xf32>
    %61 = tpu.concatenate %9, %60 in 1 : vector<8x1xf32>, vector<8x8xf32> -> vector<8x9xf32>
    %62 = arith.addf %61, %58 : vector<8x9xf32>
    %63 = vector.broadcast %59 : vector<8x1xf32> to vector<8x9xf32>
    %64 = arith.addf %50, %63 : vector<8x9xf32>
    %65 = arith.minimumf %62, %64 : vector<8x9xf32>
    %66 = arith.subf %65, %26 : vector<8x9xf32>
    %67 = vector.extract_strided_slice %66 {offsets = [0, 0], sizes = [8, 8], strides = [1, 1]} : vector<8x9xf32> to vector<8x8xf32>
    %68 = tpu.concatenate %9, %67 in 1 : vector<8x1xf32>, vector<8x8xf32> -> vector<8x9xf32>
    %69 = arith.minimumf %66, %68 : vector<8x9xf32>
    %70 = vector.extract_strided_slice %69 {offsets = [0, 0], sizes = [8, 7], strides = [1, 1]} : vector<8x9xf32> to vector<8x7xf32>
    %71 = tpu.concatenate %10, %70 in 1 : vector<8x2xf32>, vector<8x7xf32> -> vector<8x9xf32>
    %72 = arith.minimumf %69, %71 : vector<8x9xf32>
    %73 = vector.extract_strided_slice %72 {offsets = [0, 0], sizes = [8, 5], strides = [1, 1]} : vector<8x9xf32> to vector<8x5xf32>
    %74 = tpu.concatenate %11, %73 in 1 : vector<8x4xf32>, vector<8x5xf32> -> vector<8x9xf32>
    %75 = arith.minimumf %72, %74 : vector<8x9xf32>
    %76 = vector.extract_strided_slice %75 {offsets = [0, 0], sizes = [8, 1], strides = [1, 1]} : vector<8x9xf32> to vector<8x1xf32>
    %77 = tpu.concatenate %12, %76 in 1 : vector<8x8xf32>, vector<8x1xf32> -> vector<8x9xf32>
    %78 = arith.minimumf %75, %77 : vector<8x9xf32>
    %79 = arith.addf %26, %78 : vector<8x9xf32>
    %c2_i32 = arith.constant 2 : i32
    %80 = vector.broadcast %c2_i32 : i32 to vector<8x1xi32>
    %81 = arith.cmpi eq, %0, %80 : vector<8x1xi32>
    %82 = vector.shape_cast %81 : vector<8x1xi1> to vector<8x1xi1>
    %83 = vector.broadcast %82 : vector<8x1xi1> to vector<8x9xi1>
    %84 = arith.select %83, %79, %55 : vector<8x9xi1>, vector<8x9xf32>
    %c0_20 = arith.constant 0 : index
    %c2 = arith.constant 2 : index
    %c0_21 = arith.constant 0 : index
    %85 = vector.load %arg3[%c0_20, %c2, %c0_21] : memref<8x8x8xf32, #tpu.memory_space<vmem>>, vector<8x1x8xf32>
    %86 = vector.shape_cast %85 : vector<8x1x8xf32> to vector<8x8xf32>
    %87 = tpu.concatenate %9, %86 in 1 : vector<8x1xf32>, vector<8x8xf32> -> vector<8x9xf32>
    %88 = vector.extract_strided_slice %3 {offsets = [0, 2], sizes = [8, 1], strides = [1, 1]} : vector<8x8xf32> to vector<8x1xf32>
    %89 = vector.extract_strided_slice %79 {offsets = [0, 0], sizes = [8, 8], strides = [1, 1]} : vector<8x9xf32> to vector<8x8xf32>
    %90 = tpu.concatenate %9, %89 in 1 : vector<8x1xf32>, vector<8x8xf32> -> vector<8x9xf32>
    %91 = arith.addf %90, %87 : vector<8x9xf32>
    %92 = vector.broadcast %88 : vector<8x1xf32> to vector<8x9xf32>
    %93 = arith.addf %79, %92 : vector<8x9xf32>
    %94 = arith.minimumf %91, %93 : vector<8x9xf32>
    %95 = arith.subf %94, %26 : vector<8x9xf32>
    %96 = vector.extract_strided_slice %95 {offsets = [0, 0], sizes = [8, 8], strides = [1, 1]} : vector<8x9xf32> to vector<8x8xf32>
    %97 = tpu.concatenate %9, %96 in 1 : vector<8x1xf32>, vector<8x8xf32> -> vector<8x9xf32>
    %98 = arith.minimumf %95, %97 : vector<8x9xf32>
    %99 = vector.extract_strided_slice %98 {offsets = [0, 0], sizes = [8, 7], strides = [1, 1]} : vector<8x9xf32> to vector<8x7xf32>
    %100 = tpu.concatenate %10, %99 in 1 : vector<8x2xf32>, vector<8x7xf32> -> vector<8x9xf32>
    %101 = arith.minimumf %98, %100 : vector<8x9xf32>
    %102 = vector.extract_strided_slice %101 {offsets = [0, 0], sizes = [8, 5], strides = [1, 1]} : vector<8x9xf32> to vector<8x5xf32>
    %103 = tpu.concatenate %11, %102 in 1 : vector<8x4xf32>, vector<8x5xf32> -> vector<8x9xf32>
    %104 = arith.minimumf %101, %103 : vector<8x9xf32>
    %105 = vector.extract_strided_slice %104 {offsets = [0, 0], sizes = [8, 1], strides = [1, 1]} : vector<8x9xf32> to vector<8x1xf32>
    %106 = tpu.concatenate %12, %105 in 1 : vector<8x8xf32>, vector<8x1xf32> -> vector<8x9xf32>
    %107 = arith.minimumf %104, %106 : vector<8x9xf32>
    %108 = arith.addf %26, %107 : vector<8x9xf32>
    %c3_i32 = arith.constant 3 : i32
    %109 = vector.broadcast %c3_i32 : i32 to vector<8x1xi32>
    %110 = arith.cmpi eq, %0, %109 : vector<8x1xi32>
    %111 = vector.shape_cast %110 : vector<8x1xi1> to vector<8x1xi1>
    %112 = vector.broadcast %111 : vector<8x1xi1> to vector<8x9xi1>
    %113 = arith.select %112, %108, %84 : vector<8x9xi1>, vector<8x9xf32>
    %c0_22 = arith.constant 0 : index
    %c3 = arith.constant 3 : index
    %c0_23 = arith.constant 0 : index
    %114 = vector.load %arg3[%c0_22, %c3, %c0_23] : memref<8x8x8xf32, #tpu.memory_space<vmem>>, vector<8x1x8xf32>
    %115 = vector.shape_cast %114 : vector<8x1x8xf32> to vector<8x8xf32>
    %116 = tpu.concatenate %9, %115 in 1 : vector<8x1xf32>, vector<8x8xf32> -> vector<8x9xf32>
    %117 = vector.extract_strided_slice %3 {offsets = [0, 3], sizes = [8, 1], strides = [1, 1]} : vector<8x8xf32> to vector<8x1xf32>
    %118 = vector.extract_strided_slice %108 {offsets = [0, 0], sizes = [8, 8], strides = [1, 1]} : vector<8x9xf32> to vector<8x8xf32>
    %119 = tpu.concatenate %9, %118 in 1 : vector<8x1xf32>, vector<8x8xf32> -> vector<8x9xf32>
    %120 = arith.addf %119, %116 : vector<8x9xf32>
    %121 = vector.broadcast %117 : vector<8x1xf32> to vector<8x9xf32>
    %122 = arith.addf %108, %121 : vector<8x9xf32>
    %123 = arith.minimumf %120, %122 : vector<8x9xf32>
    %124 = arith.subf %123, %26 : vector<8x9xf32>
    %125 = vector.extract_strided_slice %124 {offsets = [0, 0], sizes = [8, 8], strides = [1, 1]} : vector<8x9xf32> to vector<8x8xf32>
    %126 = tpu.concatenate %9, %125 in 1 : vector<8x1xf32>, vector<8x8xf32> -> vector<8x9xf32>
    %127 = arith.minimumf %124, %126 : vector<8x9xf32>
    %128 = vector.extract_strided_slice %127 {offsets = [0, 0], sizes = [8, 7], strides = [1, 1]} : vector<8x9xf32> to vector<8x7xf32>
    %129 = tpu.concatenate %10, %128 in 1 : vector<8x2xf32>, vector<8x7xf32> -> vector<8x9xf32>
    %130 = arith.minimumf %127, %129 : vector<8x9xf32>
    %131 = vector.extract_strided_slice %130 {offsets = [0, 0], sizes = [8, 5], strides = [1, 1]} : vector<8x9xf32> to vector<8x5xf32>
    %132 = tpu.concatenate %11, %131 in 1 : vector<8x4xf32>, vector<8x5xf32> -> vector<8x9xf32>
    %133 = arith.minimumf %130, %132 : vector<8x9xf32>
    %134 = vector.extract_strided_slice %133 {offsets = [0, 0], sizes = [8, 1], strides = [1, 1]} : vector<8x9xf32> to vector<8x1xf32>
    %135 = tpu.concatenate %12, %134 in 1 : vector<8x8xf32>, vector<8x1xf32> -> vector<8x9xf32>
    %136 = arith.minimumf %133, %135 : vector<8x9xf32>
    %137 = arith.addf %26, %136 : vector<8x9xf32>
    %c4_i32 = arith.constant 4 : i32
    %138 = vector.broadcast %c4_i32 : i32 to vector<8x1xi32>
    %139 = arith.cmpi eq, %0, %138 : vector<8x1xi32>
    %140 = vector.shape_cast %139 : vector<8x1xi1> to vector<8x1xi1>
    %141 = vector.broadcast %140 : vector<8x1xi1> to vector<8x9xi1>
    %142 = arith.select %141, %137, %113 : vector<8x9xi1>, vector<8x9xf32>
    %c0_24 = arith.constant 0 : index
    %c4 = arith.constant 4 : index
    %c0_25 = arith.constant 0 : index
    %143 = vector.load %arg3[%c0_24, %c4, %c0_25] : memref<8x8x8xf32, #tpu.memory_space<vmem>>, vector<8x1x8xf32>
    %144 = vector.shape_cast %143 : vector<8x1x8xf32> to vector<8x8xf32>
    %145 = tpu.concatenate %9, %144 in 1 : vector<8x1xf32>, vector<8x8xf32> -> vector<8x9xf32>
    %146 = vector.extract_strided_slice %3 {offsets = [0, 4], sizes = [8, 1], strides = [1, 1]} : vector<8x8xf32> to vector<8x1xf32>
    %147 = vector.extract_strided_slice %137 {offsets = [0, 0], sizes = [8, 8], strides = [1, 1]} : vector<8x9xf32> to vector<8x8xf32>
    %148 = tpu.concatenate %9, %147 in 1 : vector<8x1xf32>, vector<8x8xf32> -> vector<8x9xf32>
    %149 = arith.addf %148, %145 : vector<8x9xf32>
    %150 = vector.broadcast %146 : vector<8x1xf32> to vector<8x9xf32>
    %151 = arith.addf %137, %150 : vector<8x9xf32>
    %152 = arith.minimumf %149, %151 : vector<8x9xf32>
    %153 = arith.subf %152, %26 : vector<8x9xf32>
    %154 = vector.extract_strided_slice %153 {offsets = [0, 0], sizes = [8, 8], strides = [1, 1]} : vector<8x9xf32> to vector<8x8xf32>
    %155 = tpu.concatenate %9, %154 in 1 : vector<8x1xf32>, vector<8x8xf32> -> vector<8x9xf32>
    %156 = arith.minimumf %153, %155 : vector<8x9xf32>
    %157 = vector.extract_strided_slice %156 {offsets = [0, 0], sizes = [8, 7], strides = [1, 1]} : vector<8x9xf32> to vector<8x7xf32>
    %158 = tpu.concatenate %10, %157 in 1 : vector<8x2xf32>, vector<8x7xf32> -> vector<8x9xf32>
    %159 = arith.minimumf %156, %158 : vector<8x9xf32>
    %160 = vector.extract_strided_slice %159 {offsets = [0, 0], sizes = [8, 5], strides = [1, 1]} : vector<8x9xf32> to vector<8x5xf32>
    %161 = tpu.concatenate %11, %160 in 1 : vector<8x4xf32>, vector<8x5xf32> -> vector<8x9xf32>
    %162 = arith.minimumf %159, %161 : vector<8x9xf32>
    %163 = vector.extract_strided_slice %162 {offsets = [0, 0], sizes = [8, 1], strides = [1, 1]} : vector<8x9xf32> to vector<8x1xf32>
    %164 = tpu.concatenate %12, %163 in 1 : vector<8x8xf32>, vector<8x1xf32> -> vector<8x9xf32>
    %165 = arith.minimumf %162, %164 : vector<8x9xf32>
    %166 = arith.addf %26, %165 : vector<8x9xf32>
    %c5_i32 = arith.constant 5 : i32
    %167 = vector.broadcast %c5_i32 : i32 to vector<8x1xi32>
    %168 = arith.cmpi eq, %0, %167 : vector<8x1xi32>
    %169 = vector.shape_cast %168 : vector<8x1xi1> to vector<8x1xi1>
    %170 = vector.broadcast %169 : vector<8x1xi1> to vector<8x9xi1>
    %171 = arith.select %170, %166, %142 : vector<8x9xi1>, vector<8x9xf32>
    %c0_26 = arith.constant 0 : index
    %c5 = arith.constant 5 : index
    %c0_27 = arith.constant 0 : index
    %172 = vector.load %arg3[%c0_26, %c5, %c0_27] : memref<8x8x8xf32, #tpu.memory_space<vmem>>, vector<8x1x8xf32>
    %173 = vector.shape_cast %172 : vector<8x1x8xf32> to vector<8x8xf32>
    %174 = tpu.concatenate %9, %173 in 1 : vector<8x1xf32>, vector<8x8xf32> -> vector<8x9xf32>
    %175 = vector.extract_strided_slice %3 {offsets = [0, 5], sizes = [8, 1], strides = [1, 1]} : vector<8x8xf32> to vector<8x1xf32>
    %176 = vector.extract_strided_slice %166 {offsets = [0, 0], sizes = [8, 8], strides = [1, 1]} : vector<8x9xf32> to vector<8x8xf32>
    %177 = tpu.concatenate %9, %176 in 1 : vector<8x1xf32>, vector<8x8xf32> -> vector<8x9xf32>
    %178 = arith.addf %177, %174 : vector<8x9xf32>
    %179 = vector.broadcast %175 : vector<8x1xf32> to vector<8x9xf32>
    %180 = arith.addf %166, %179 : vector<8x9xf32>
    %181 = arith.minimumf %178, %180 : vector<8x9xf32>
    %182 = arith.subf %181, %26 : vector<8x9xf32>
    %183 = vector.extract_strided_slice %182 {offsets = [0, 0], sizes = [8, 8], strides = [1, 1]} : vector<8x9xf32> to vector<8x8xf32>
    %184 = tpu.concatenate %9, %183 in 1 : vector<8x1xf32>, vector<8x8xf32> -> vector<8x9xf32>
    %185 = arith.minimumf %182, %184 : vector<8x9xf32>
    %186 = vector.extract_strided_slice %185 {offsets = [0, 0], sizes = [8, 7], strides = [1, 1]} : vector<8x9xf32> to vector<8x7xf32>
    %187 = tpu.concatenate %10, %186 in 1 : vector<8x2xf32>, vector<8x7xf32> -> vector<8x9xf32>
    %188 = arith.minimumf %185, %187 : vector<8x9xf32>
    %189 = vector.extract_strided_slice %188 {offsets = [0, 0], sizes = [8, 5], strides = [1, 1]} : vector<8x9xf32> to vector<8x5xf32>
    %190 = tpu.concatenate %11, %189 in 1 : vector<8x4xf32>, vector<8x5xf32> -> vector<8x9xf32>
    %191 = arith.minimumf %188, %190 : vector<8x9xf32>
    %192 = vector.extract_strided_slice %191 {offsets = [0, 0], sizes = [8, 1], strides = [1, 1]} : vector<8x9xf32> to vector<8x1xf32>
    %193 = tpu.concatenate %12, %192 in 1 : vector<8x8xf32>, vector<8x1xf32> -> vector<8x9xf32>
    %194 = arith.minimumf %191, %193 : vector<8x9xf32>
    %195 = arith.addf %26, %194 : vector<8x9xf32>
    %c6_i32 = arith.constant 6 : i32
    %196 = vector.broadcast %c6_i32 : i32 to vector<8x1xi32>
    %197 = arith.cmpi eq, %0, %196 : vector<8x1xi32>
    %198 = vector.shape_cast %197 : vector<8x1xi1> to vector<8x1xi1>
    %199 = vector.broadcast %198 : vector<8x1xi1> to vector<8x9xi1>
    %200 = arith.select %199, %195, %171 : vector<8x9xi1>, vector<8x9xf32>
    %c0_28 = arith.constant 0 : index
    %c6 = arith.constant 6 : index
    %c0_29 = arith.constant 0 : index
    %201 = vector.load %arg3[%c0_28, %c6, %c0_29] : memref<8x8x8xf32, #tpu.memory_space<vmem>>, vector<8x1x8xf32>
    %202 = vector.shape_cast %201 : vector<8x1x8xf32> to vector<8x8xf32>
    %203 = tpu.concatenate %9, %202 in 1 : vector<8x1xf32>, vector<8x8xf32> -> vector<8x9xf32>
    %204 = vector.extract_strided_slice %3 {offsets = [0, 6], sizes = [8, 1], strides = [1, 1]} : vector<8x8xf32> to vector<8x1xf32>
    %205 = vector.extract_strided_slice %195 {offsets = [0, 0], sizes = [8, 8], strides = [1, 1]} : vector<8x9xf32> to vector<8x8xf32>
    %206 = tpu.concatenate %9, %205 in 1 : vector<8x1xf32>, vector<8x8xf32> -> vector<8x9xf32>
    %207 = arith.addf %206, %203 : vector<8x9xf32>
    %208 = vector.broadcast %204 : vector<8x1xf32> to vector<8x9xf32>
    %209 = arith.addf %195, %208 : vector<8x9xf32>
    %210 = arith.minimumf %207, %209 : vector<8x9xf32>
    %211 = arith.subf %210, %26 : vector<8x9xf32>
    %212 = vector.extract_strided_slice %211 {offsets = [0, 0], sizes = [8, 8], strides = [1, 1]} : vector<8x9xf32> to vector<8x8xf32>
    %213 = tpu.concatenate %9, %212 in 1 : vector<8x1xf32>, vector<8x8xf32> -> vector<8x9xf32>
    %214 = arith.minimumf %211, %213 : vector<8x9xf32>
    %215 = vector.extract_strided_slice %214 {offsets = [0, 0], sizes = [8, 7], strides = [1, 1]} : vector<8x9xf32> to vector<8x7xf32>
    %216 = tpu.concatenate %10, %215 in 1 : vector<8x2xf32>, vector<8x7xf32> -> vector<8x9xf32>
    %217 = arith.minimumf %214, %216 : vector<8x9xf32>
    %218 = vector.extract_strided_slice %217 {offsets = [0, 0], sizes = [8, 5], strides = [1, 1]} : vector<8x9xf32> to vector<8x5xf32>
    %219 = tpu.concatenate %11, %218 in 1 : vector<8x4xf32>, vector<8x5xf32> -> vector<8x9xf32>
    %220 = arith.minimumf %217, %219 : vector<8x9xf32>
    %221 = vector.extract_strided_slice %220 {offsets = [0, 0], sizes = [8, 1], strides = [1, 1]} : vector<8x9xf32> to vector<8x1xf32>
    %222 = tpu.concatenate %12, %221 in 1 : vector<8x8xf32>, vector<8x1xf32> -> vector<8x9xf32>
    %223 = arith.minimumf %220, %222 : vector<8x9xf32>
    %224 = arith.addf %26, %223 : vector<8x9xf32>
    %c7_i32 = arith.constant 7 : i32
    %225 = vector.broadcast %c7_i32 : i32 to vector<8x1xi32>
    %226 = arith.cmpi eq, %0, %225 : vector<8x1xi32>
    %227 = vector.shape_cast %226 : vector<8x1xi1> to vector<8x1xi1>
    %228 = vector.broadcast %227 : vector<8x1xi1> to vector<8x9xi1>
    %229 = arith.select %228, %224, %200 : vector<8x9xi1>, vector<8x9xf32>
    %c0_30 = arith.constant 0 : index
    %c7 = arith.constant 7 : index
    %c0_31 = arith.constant 0 : index
    %230 = vector.load %arg3[%c0_30, %c7, %c0_31] : memref<8x8x8xf32, #tpu.memory_space<vmem>>, vector<8x1x8xf32>
    %231 = vector.shape_cast %230 : vector<8x1x8xf32> to vector<8x8xf32>
    %232 = tpu.concatenate %9, %231 in 1 : vector<8x1xf32>, vector<8x8xf32> -> vector<8x9xf32>
    %233 = vector.extract_strided_slice %3 {offsets = [0, 7], sizes = [8, 1], strides = [1, 1]} : vector<8x8xf32> to vector<8x1xf32>
    %234 = vector.extract_strided_slice %224 {offsets = [0, 0], sizes = [8, 8], strides = [1, 1]} : vector<8x9xf32> to vector<8x8xf32>
    %235 = tpu.concatenate %9, %234 in 1 : vector<8x1xf32>, vector<8x8xf32> -> vector<8x9xf32>
    %236 = arith.addf %235, %232 : vector<8x9xf32>
    %237 = vector.broadcast %233 : vector<8x1xf32> to vector<8x9xf32>
    %238 = arith.addf %224, %237 : vector<8x9xf32>
    %239 = arith.minimumf %236, %238 : vector<8x9xf32>
    %240 = arith.subf %239, %26 : vector<8x9xf32>
    %241 = vector.extract_strided_slice %240 {offsets = [0, 0], sizes = [8, 8], strides = [1, 1]} : vector<8x9xf32> to vector<8x8xf32>
    %242 = tpu.concatenate %9, %241 in 1 : vector<8x1xf32>, vector<8x8xf32> -> vector<8x9xf32>
    %243 = arith.minimumf %240, %242 : vector<8x9xf32>
    %244 = vector.extract_strided_slice %243 {offsets = [0, 0], sizes = [8, 7], strides = [1, 1]} : vector<8x9xf32> to vector<8x7xf32>
    %245 = tpu.concatenate %10, %244 in 1 : vector<8x2xf32>, vector<8x7xf32> -> vector<8x9xf32>
    %246 = arith.minimumf %243, %245 : vector<8x9xf32>
    %247 = vector.extract_strided_slice %246 {offsets = [0, 0], sizes = [8, 5], strides = [1, 1]} : vector<8x9xf32> to vector<8x5xf32>
    %248 = tpu.concatenate %11, %247 in 1 : vector<8x4xf32>, vector<8x5xf32> -> vector<8x9xf32>
    %249 = arith.minimumf %246, %248 : vector<8x9xf32>
    %250 = vector.extract_strided_slice %249 {offsets = [0, 0], sizes = [8, 1], strides = [1, 1]} : vector<8x9xf32> to vector<8x1xf32>
    %251 = tpu.concatenate %12, %250 in 1 : vector<8x8xf32>, vector<8x1xf32> -> vector<8x9xf32>
    %252 = arith.minimumf %249, %251 : vector<8x9xf32>
    %253 = arith.addf %26, %252 : vector<8x9xf32>
    %c8_i32 = arith.constant 8 : i32
    %254 = vector.broadcast %c8_i32 : i32 to vector<8x1xi32>
    %255 = arith.cmpi eq, %0, %254 : vector<8x1xi32>
    %256 = vector.shape_cast %255 : vector<8x1xi1> to vector<8x1xi1>
    %257 = vector.broadcast %256 : vector<8x1xi1> to vector<8x9xi1>
    %258 = arith.select %257, %253, %229 : vector<8x9xi1>, vector<8x9xf32>
    %259 = vector.broadcast %1 : vector<8x1xi32> to vector<8x9xi32>
    %260 = arith.cmpi eq, %4, %259 : vector<8x9xi32>
    %cst_32 = arith.constant 0.000000e+00 : f32
    %261 = vector.broadcast %cst_32 : f32 to vector<8x9xf32>
    %262 = arith.select %260, %258, %261 : vector<8x9xi1>, vector<8x9xf32>
    %cst_33 = arith.constant dense<0.000000e+00> : vector<8xf32>
    %263 = vector.multi_reduction <add>, %262, %cst_33 [1] : vector<8x9xf32> to vector<8xf32>
    %264 = vector.shape_cast %263 : vector<8xf32> to vector<8x1xf32>
    %c0_34 = arith.constant 0 : index
    %c0_35 = arith.constant 0 : index
    %265 = vector.load %arg6[%c0_34, %c0_35] : memref<8x1xf32, #tpu.memory_space<vmem>>, vector<8x1xf32>
    tpu.vector_store %arg6[%c0_34, %c0_35], %264 {strides = array<i32>} : memref<8x1xf32, #tpu.memory_space<vmem>>, vector<8x1xf32>,
    return
  }
  func.func @transform_0(%arg0: i32) -> (i32, i32) {
    %c0_i32 = arith.constant 0 : i32
    %c0_i32_0 = arith.constant 0 : i32
    return %arg0, %c0_i32 : i32, i32
  }
  func.func @transform_1(%arg0: i32) -> (i32, i32) {
    %c0_i32 = arith.constant 0 : i32
    %c0_i32_0 = arith.constant 0 : i32
    return %arg0, %c0_i32 : i32, i32
  }
  func.func @transform_2(%arg0: i32) -> (i32, i32, i32) {
    %c0_i32 = arith.constant 0 : i32
    %c0_i32_0 = arith.constant 0 : i32
    %c0_i32_1 = arith.constant 0 : i32
    return %arg0, %c0_i32, %c0_i32_0 : i32, i32, i32
  }
  func.func @transform_3(%arg0: i32) -> (i32, i32) {
    %c0_i32 = arith.constant 0 : i32
    %c0_i32_0 = arith.constant 0 : i32
    return %arg0, %c0_i32 : i32, i32
  }
  func.func @transform_4(%arg0: i32) -> (i32, i32) {
    %c0_i32 = arith.constant 0 : i32
    %c0_i32_0 = arith.constant 0 : i32
    return %arg0, %c0_i32 : i32, i32
  }
  func.func @transform_5(%arg0: i32) -> (i32, i32) {
    %c0_i32 = arith.constant 0 : i32
    %c0_i32_0 = arith.constant 0 : i32
    return %arg0, %c0_i32 : i32, i32
  }
}

</mosaic_0001>

<bundles_post_ra>
// kernel: matching_model_forward.1
= control target key start
LH: loop header
LB: loop body
LE: loop exit
PB: predicated region body
PF: predicated region fallthrough
CT: control target
= control target key end

     0   :  { %s734_s20 = smov 1   ;;  %vm30_vm0 = vcmask 7168   ;;  %v735_v3 = vmov 0   ;;  %s736_s21 = smov 2   ;;  %vm42_vm1 = vcmask 15360   ;;  %vm76_vm2 = vcmask 1041409   ;;  %s1222_s3 = inlined_call_operand.vmem [shape: f32[8,8], index: 3, kind: input, shape index: {}]   ;;  %s1223_s4 = inlined_call_operand.vmem [shape: f32[8,8], index: 4, kind: input, shape index: {}]   ;;  %s1224_s2 = inlined_call_operand.vmem [shape: f32[8,8,8], index: 2, kind: input, shape index: {}]   ;;  %s1225_s0 = inlined_call_operand.vmem [shape: s32[8,1], index: 0, kind: input, shape index: {}]   ;;  %s1226_s1 = inlined_call_operand.vmem [shape: s32[8,1], index: 1, kind: input, shape index: {}]   ;;  %s1227_s5 = inlined_call_operand.vmem [shape: f32[8,1], index: 5, kind: output, shape index: {}]  }
   0x1   :  { %v22_v0 = vld [vmem:[%s1222_s3] sm:$0xff]  ;;  %725 = vset.pattern.permute.xlu1 %v735_v3  ;;  %s737_s3 = smov 4   ;;  %v60_v11 = vld [vmem:[%s1224_s2 + $0x8] sm:$0x1]  ;;  %v61_v12 = vld [vmem:[%s1224_s2 + $0x10] sm:$0x1] }
   0x2   :  { %27 = vrot.lane.b32.xlu0 %v22_v0, %s734_s20  ;;  %v790_v10 = vld [vmem:[%s1223_s4] sm:$0xff]  ;;  %v75_v13 = vrot.slane %v60_v11, 7  ;;  %v62_v15 = vld [vmem:[%s1224_s2 + $0x18] sm:$0x1]  ;;  %v78_v16 = vrot.slane %v61_v12, 6  ;;  %vm79_vm3 = vcmask 1042434  }
   0x3   :  { %v59_v14 = vld [vmem:[%s1224_s2] sm:$0x1]  ;;  %v81_v19 = vrot.slane %v62_v15, 5  ;;  %vm82_vm4 = vcmask 1043459   ;;  %v64_v21 = vld [vmem:[%s1224_s2 + $0x28] sm:$0x1] }
   0x4   :  { %v77_v17 = vsel %vm76_vm2, %v75_v13, %v59_v14  ;;  %v63_v18 = vld [vmem:[%s1224_s2 + $0x20] sm:$0x1]  ;;  %vm85_vm5 = vcmask 1044484   ;;  %v65_v24 = vld [vmem:[%s1224_s2 + $0x30] sm:$0x1]  ;;  %v87_v25 = vrot.slane %v64_v21, 3 }
   0x5   :  { %v80_v20 = vsel %vm79_vm3, %v78_v16, %v77_v17  ;;  %v84_v22 = vrot.slane %v63_v18, 4  ;;  %vm88_vm6 = vcmask 1045509   ;;  %vm49_vm7 = vcmask 31744   ;;  %v66_v27 = vld [vmem:[%s1224_s2 + $0x38] sm:$0x1]  ;;  %s738_s14 = smov 8  }
   0x6   :  { %v83_v23 = vsel %vm82_vm4, %v81_v19, %v80_v20  ;;  %v90_v28 = vrot.slane %v65_v24, 2  ;;  %vm91_vm8 = vcmask 1046534   ;;  %v93_v32 = vrot.slane %v66_v27, 1  ;;  %v147_v55 = vld [vmem:[%s1224_s2 + $0x9] sm:$0x1] }
   0x7   :  { %v86_v26 = vsel %vm85_vm5, %v84_v22, %v83_v23  ;;  %vm94_vm9 = vcmask 1047559   ;;  %vm56_vm10 = vcmask 64512   ;;  %v739_v48 = vmov 1   ;;  %v148_v56 = vld [vmem:[%s1224_s2 + $0x11] sm:$0x1] }
   0x8   :  { %v89_v29 = vsel %vm88_vm6, %v87_v25, %v86_v26  ;;  %726 = vset.pattern.permute.xlu0 %v739_v48  ;;  %v162_v57 = vrot.slane %v147_v55, 7  ;;  %v146_v58 = vld [vmem:[%s1224_s2 + $0x1] sm:$0x1]  ;;  %v149_v59 = vld [vmem:[%s1224_s2 + $0x19] sm:$0x1]  ;;  %v164_v60 = vrot.slane %v148_v56, 6 }
   0x9   :  { %v92_v34 = vsel %vm91_vm8, %v90_v28, %v89_v29  ;;  %v150_v62 = vld [vmem:[%s1224_s2 + $0x21] sm:$0x1]  ;;  %v166_v63 = vrot.slane %v149_v59, 5  ;;  %v232_v55 = vld [vmem:[%s1224_s2 + $0x3a] sm:$0x1] }
   0xa   :  { %v95_v35 = vsel %vm94_vm9, %v93_v32, %v92_v34  ;;  %v163_v61 = vsel %vm76_vm2, %v162_v57, %v146_v58 }
   0xb   :  { %v165_v0 = vsel %vm79_vm3, %v164_v60, %v163_v61  ;;  %v253_v60 = vrot.slane %v232_v55, 1 }
  0x74   :  { %v28_v1 = vpop.permute.xlu0 %27 }
  0x75   :  { %v31_v2 = vsel %vm30_vm0, 0.0, %v28_v1  ;;  %v151_v1 = vld [vmem:[%s1224_s2 + $0x29] sm:$0x1] }
  0x76   :  { %33 = vrot.lane.b32.xlu0 %v31_v2, %s734_s20 }
  0xe8   :  { %v34_v4 = vpop.permute.xlu0 %33 }
  0xe9   :  { %v36_v5 = vsel %vm30_vm0, 0.0, %v34_v4  ;;  %v167_v4 = vsel %vm82_vm4, %v166_v63, %v165_v0 }
  0xea   :  { %v37_v6 = vadd.f32 %v36_v5, %v31_v2  ;;  %v168_v2 = vrot.slane %v150_v62, 4  ;;  %v152_v5 = vld [vmem:[%s1224_s2 + $0x31] sm:$0x1] }
  0xec   :  { %39 = vrot.lane.b32.xlu1 %v37_v6, %s736_s21 }
 0x15e   :  { %v40_v7 = vpop.permute.xlu1 %39 }
 0x15f   :  { %v43_v8 = vsel %vm42_vm1, 0.0, %v40_v7  ;;  %v169_v7 = vsel %vm85_vm5, %v168_v2, %v167_v4 }
 0x160   :  { %v44_v9 = vadd.f32 %v43_v8, %v37_v6  ;;  %v170_v6 = vrot.slane %v151_v1, 3  ;;  %v153_v8 = vld [vmem:[%s1224_s2 + $0x39] sm:$0x1] }
 0x161   :  { %v174_v14 = vrot.slane %v153_v8, 1 }
 0x162   :  { %46 = vrot.lane.b32.xlu1 %v44_v9, %s737_s3  ;;  %v171_v11 = vsel %vm88_vm6, %v170_v6, %v169_v7 }
 0x166   :  { %108 = vperm.xlu1 %725, %v790_v10  }
 0x1d4   :  { %v47_v30 = vpop.permute.xlu1 %46 }
 0x1d5   :  { %v50_v31 = vsel %vm49_vm7, 0.0, %v47_v30 }
 0x1d6   :  { %v51_v33 = vadd.f32 %v50_v31, %v44_v9  ;;  %v172_v9 = vrot.slane %v152_v5, 2  ;;  %v740_v31 = vmov 2  }
 0x1d8   :  { %53 = vrot.lane.b32.xlu0 %v51_v33, %s738_s14  ;;  %v173_v16 = vsel %vm91_vm8, %v172_v9, %v171_v11 }
 0x1d9   :  { %v175_v17 = vsel %vm94_vm9, %v174_v14, %v173_v16 }
 0x1dc   :  { %96 = vrot.lane.b32.xlu0 %v95_v35, %s734_s20 }
 0x1e5   :  { %v109_v39 = vpop.permute.xlu1 %108 }
 0x24a   :  { %v54_v36 = vpop.permute.xlu0 %53 }
 0x24b   :  { %v57_v37 = vsel %vm56_vm10, 0.0, %v54_v36 }
 0x24c   :  { %v828_v38 = vadd.f32 %v57_v37, %v51_v33 }
 0x24e   :  { %101 = vrot.lane.b32.xlu1 %v828_v38, %s734_s20  ;;  %v97_v40 = vpop.permute.xlu0 %96  ;;  %v111_v44 = vadd.f32 %v109_v39, %v828_v38  ;;  %v226_v39 = vld [vmem:[%s1224_s2 + $0xa] sm:$0x1] }
 0x24f   :  { %v99_v41 = vsel %vm30_vm0, 1e+30, %v97_v40  ;;  %v227_v40 = vld [vmem:[%s1224_s2 + $0x12] sm:$0x1] }
 0x2c0   :  { %v102_v42 = vpop.permute.xlu1 %101 }
 0x2c1   :  { %v104_v43 = vsel %vm30_vm0, 1e+30, %v102_v42  ;;  %v225_v42 = vld [vmem:[%s1224_s2 + $0x2] sm:$0x1] }
 0x2c2   :  { %v105_v45 = vadd.f32 %v104_v43, %v99_v41  ;;  %v241_v41 = vrot.slane %v226_v39, 7  ;;  %v228_v43 = vld [vmem:[%s1224_s2 + $0x1a] sm:$0x1] }
 0x2c4   :  { %v112_v46 = vmin.f32 %v105_v45, %v111_v44  ;;  %v243_v44 = vrot.slane %v227_v40, 6  ;;  %v242_v45 = vsel %vm76_vm2, %v241_v41, %v225_v42  ;;  %v311_v40 = vld [vmem:[%s1224_s2 + $0x3b] sm:$0x1] }
 0x2c6   :  { %v113_v47 = vsub.f32 %v112_v46, %v828_v38  ;;  %v229_v46 = vld [vmem:[%s1224_s2 + $0x22] sm:$0x1]  ;;  %v244_v48 = vsel %vm79_vm3, %v243_v44, %v242_v45  ;;  %v332_v45 = vrot.slane %v311_v40, 1 }
 0x2c8   :  { %115 = vrot.lane.b32.xlu0 %v113_v47, %s734_s20 }
 0x33a   :  { %v116_v49 = vpop.permute.xlu0 %115 }
 0x33b   :  { %v118_v50 = vsel %vm30_vm0, 1e+30, %v116_v49  ;;  %v230_v49 = vld [vmem:[%s1224_s2 + $0x2a] sm:$0x1] }
 0x33c   :  { %v119_v51 = vmin.f32 %v113_v47, %v118_v50  ;;  %v245_v47 = vrot.slane %v228_v43, 5  ;;  %v247_v50 = vrot.slane %v229_v46, 4 }
 0x33e   :  { %121 = vrot.lane.b32.xlu1 %v119_v51, %s736_s21 }
 0x3b0   :  { %v122_v52 = vpop.permute.xlu1 %121 }
 0x3b1   :  { %v124_v53 = vsel %vm42_vm1, 1e+30, %v122_v52  ;;  %v231_v52 = vld [vmem:[%s1224_s2 + $0x32] sm:$0x1] }
 0x3b2   :  { %v125_v54 = vmin.f32 %v119_v51, %v124_v53  ;;  %v246_v51 = vsel %vm82_vm4, %v245_v47, %v244_v48  ;;  %v249_v53 = vrot.slane %v230_v49, 3  ;;  %v251_v56 = vrot.slane %v231_v52, 2 }
 0x3b4   :  { %127 = vrot.lane.b32.xlu0 %v125_v54, %s737_s3 }
 0x3b8   :  { %187 = vperm.xlu0 %726, %v790_v10  }
 0x3bc   :  { %727 = vset.pattern.permute.xlu0 %v740_v31 }
 0x426   :  { %v128_v12 = vpop.permute.xlu0 %127 }
 0x427   :  { %v130_v13 = vsel %vm49_vm7, 1e+30, %v128_v12 }
 0x428   :  { %v131_v15 = vmin.f32 %v125_v54, %v130_v13  ;;  %v248_v54 = vsel %vm85_vm5, %v247_v50, %v246_v51 }
 0x429   :  { %v250_v57 = vsel %vm88_vm6, %v249_v53, %v248_v54 }
 0x42a   :  { %133 = vrot.lane.b32.xlu1 %v131_v15, %s738_s14  ;;  %v252_v62 = vsel %vm91_vm8, %v251_v56, %v250_v57 }
 0x42b   :  { %v254_v63 = vsel %vm94_vm9, %v253_v60, %v252_v62  ;;  %v742_v62 = vmov 4  }
 0x42e   :  { %176 = vrot.lane.b32.xlu1 %v175_v17, %s734_s20 }
 0x437   :  { %v188_v23 = vpop.permute.xlu0 %187 }
 0x49c   :  { %v134_v18 = vpop.permute.xlu1 %133 }
 0x49d   :  { %v136_v19 = vsel %vm56_vm10, 1e+30, %v134_v18 }
 0x49e   :  { %v137_v20 = vmin.f32 %v131_v15, %v136_v19  ;;  %v741_v15 = vmov 3  }
 0x4a0   :  { %v878_v21 = vadd.f32 %v137_v20, %v828_v38  ;;  %v177_v22 = vpop.permute.xlu1 %176 }
 0x4a1   :  { %v179_v25 = vsel %vm30_vm0, 1e+30, %v177_v22 }
 0x4a2   :  { %181 = vrot.lane.b32.xlu1 %v878_v21, %s734_s20  ;;  %v190_v27 = vadd.f32 %v188_v23, %v878_v21  ;;  %v305_v23 = vld [vmem:[%s1224_s2 + $0xb] sm:$0x1] }
 0x514   :  { %v182_v24 = vpop.permute.xlu1 %181 }
 0x515   :  { %v184_v26 = vsel %vm30_vm0, 1e+30, %v182_v24  ;;  %v306_v24 = vld [vmem:[%s1224_s2 + $0x13] sm:$0x1] }
 0x516   :  { %v185_v28 = vadd.f32 %v184_v26, %v179_v25  ;;  %v320_v25 = vrot.slane %v305_v23, 7  ;;  %v304_v26 = vld [vmem:[%s1224_s2 + $0x3] sm:$0x1] }
 0x518   :  { %v191_v29 = vmin.f32 %v185_v28, %v190_v27  ;;  %v307_v27 = vld [vmem:[%s1224_s2 + $0x1b] sm:$0x1]  ;;  %v322_v28 = vrot.slane %v306_v24, 6 }
 0x519   :  { %v324_v31 = vrot.slane %v307_v27, 5 }
 0x51a   :  { %v192_v30 = vsub.f32 %v191_v29, %v828_v38  ;;  %v321_v29 = vsel %vm76_vm2, %v320_v25, %v304_v26  ;;  %v390_v25 = vld [vmem:[%s1224_s2 + $0x3c] sm:$0x1] }
 0x51c   :  { %194 = vrot.lane.b32.xlu0 %v192_v30, %s734_s20 }
 0x58e   :  { %v195_v32 = vpop.permute.xlu0 %194 }
 0x58f   :  { %v197_v33 = vsel %vm30_vm0, 1e+30, %v195_v32  ;;  %v323_v32 = vsel %vm79_vm3, %v322_v28, %v321_v29 }
 0x590   :  { %v198_v34 = vmin.f32 %v192_v30, %v197_v33  ;;  %v308_v30 = vld [vmem:[%s1224_s2 + $0x23] sm:$0x1]  ;;  %v309_v33 = vld [vmem:[%s1224_s2 + $0x2b] sm:$0x1] }
 0x592   :  { %200 = vrot.lane.b32.xlu1 %v198_v34, %s736_s21 }
 0x604   :  { %v201_v35 = vpop.permute.xlu1 %200 }
 0x605   :  { %v203_v36 = vsel %vm42_vm1, 1e+30, %v201_v35  ;;  %v325_v35 = vsel %vm82_vm4, %v324_v31, %v323_v32 }
 0x606   :  { %v204_v37 = vmin.f32 %v198_v34, %v203_v36  ;;  %v326_v34 = vrot.slane %v308_v30, 4  ;;  %v310_v36 = vld [vmem:[%s1224_s2 + $0x33] sm:$0x1]  ;;  %v411_v30 = vrot.slane %v390_v25, 1 }
 0x607   :  { %v330_v41 = vrot.slane %v310_v36, 2 }
 0x608   :  { %206 = vrot.lane.b32.xlu0 %v204_v37, %s737_s3  ;;  %v327_v39 = vsel %vm85_vm5, %v326_v34, %v325_v35 }
 0x60c   :  { %266 = vperm.xlu0 %727, %v790_v10  }
 0x610   :  { %728 = vset.pattern.permute.xlu0 %v741_v15  ;;  %v387_v15 = vld [vmem:[%s1224_s2 + $0x24] sm:$0x1] }
 0x67a   :  { %v207_v58 = vpop.permute.xlu0 %206 }
 0x67b   :  { %v209_v59 = vsel %vm49_vm7, 1e+30, %v207_v58 }
 0x67c   :  { %v210_v61 = vmin.f32 %v204_v37, %v209_v59  ;;  %v328_v37 = vrot.slane %v309_v33, 3 }
 0x67e   :  { %212 = vrot.lane.b32.xlu1 %v210_v61, %s738_s14  ;;  %v329_v42 = vsel %vm88_vm6, %v328_v37, %v327_v39 }
 0x67f   :  { %v331_v47 = vsel %vm91_vm8, %v330_v41, %v329_v42 }
 0x680   :  { %v333_v48 = vsel %vm94_vm9, %v332_v45, %v331_v47 }
 0x682   :  { %255 = vrot.lane.b32.xlu1 %v254_v63, %s734_s20 }
 0x68b   :  { %v267_v6 = vpop.permute.xlu0 %266 }
 0x6f0   :  { %v213_v0 = vpop.permute.xlu1 %212 }
 0x6f1   :  { %v215_v1 = vsel %vm56_vm10, 1e+30, %v213_v0 }
 0x6f2   :  { %v216_v2 = vmin.f32 %v210_v61, %v215_v1 }
 0x6f4   :  { %v928_v4 = vadd.f32 %v216_v2, %v828_v38  ;;  %v256_v5 = vpop.permute.xlu1 %255 }
 0x6f5   :  { %v258_v8 = vsel %vm30_vm0, 1e+30, %v256_v5 }
 0x6f6   :  { %260 = vrot.lane.b32.xlu1 %v928_v4, %s734_s20  ;;  %v269_v11 = vadd.f32 %v267_v6, %v928_v4 }
 0x768   :  { %v261_v7 = vpop.permute.xlu1 %260 }
 0x769   :  { %v263_v9 = vsel %vm30_vm0, 1e+30, %v261_v7  ;;  %v384_v7 = vld [vmem:[%s1224_s2 + $0xc] sm:$0x1] }
 0x76a   :  { %v264_v12 = vadd.f32 %v263_v9, %v258_v8  ;;  %v385_v8 = vld [vmem:[%s1224_s2 + $0x14] sm:$0x1]  ;;  %v399_v9 = vrot.slane %v384_v7, 7  ;;  %v468_v7 = vld [vmem:[%s1224_s2 + $0x35] sm:$0x1] }
 0x76c   :  { %v270_v13 = vmin.f32 %v264_v12, %v269_v11  ;;  %v383_v11 = vld [vmem:[%s1224_s2 + $0x4] sm:$0x1]  ;;  %v386_v12 = vld [vmem:[%s1224_s2 + $0x1c] sm:$0x1] }
 0x76e   :  { %v271_v14 = vsub.f32 %v270_v13, %v828_v38  ;;  %v401_v13 = vrot.slane %v385_v8, 6 }
 0x770   :  { %273 = vrot.lane.b32.xlu0 %v271_v14, %s734_s20 }
 0x7e2   :  { %v274_v16 = vpop.permute.xlu0 %273 }
 0x7e3   :  { %v276_v17 = vsel %vm30_vm0, 1e+30, %v274_v16  ;;  %v403_v16 = vrot.slane %v386_v12, 5  ;;  %v488_v12 = vrot.slane %v468_v7, 2 }
 0x7e4   :  { %v277_v18 = vmin.f32 %v271_v14, %v276_v17  ;;  %v400_v14 = vsel %vm76_vm2, %v399_v9, %v383_v11  ;;  %v469_v11 = vld [vmem:[%s1224_s2 + $0x3d] sm:$0x1] }
 0x7e5   :  { %v402_v17 = vsel %vm79_vm3, %v401_v13, %v400_v14 }
 0x7e6   :  { %279 = vrot.lane.b32.xlu1 %v277_v18, %s736_s21 }
 0x858   :  { %v280_v19 = vpop.permute.xlu1 %279 }
 0x859   :  { %v282_v20 = vsel %vm42_vm1, 1e+30, %v280_v19  ;;  %v405_v19 = vrot.slane %v387_v15, 4 }
 0x85a   :  { %v283_v22 = vmin.f32 %v277_v18, %v282_v20  ;;  %v388_v18 = vld [vmem:[%s1224_s2 + $0x2c] sm:$0x1]  ;;  %v404_v20 = vsel %vm82_vm4, %v403_v16, %v402_v17  ;;  %v490_v16 = vrot.slane %v469_v11, 1 }
 0x85b   :  { %v407_v23 = vrot.slane %v388_v18, 3  ;;  %v406_v24 = vsel %vm85_vm5, %v405_v19, %v404_v20 }
 0x85c   :  { %285 = vrot.lane.b32.xlu0 %v283_v22, %s737_s3 }
 0x85d   :  { %v408_v27 = vsel %vm88_vm6, %v407_v23, %v406_v24 }
 0x860   :  { %345 = vperm.xlu0 %728, %v790_v10  }
 0x864   :  { %729 = vset.pattern.permute.xlu0 %v742_v62 }
 0x8ce   :  { %v286_v43 = vpop.permute.xlu0 %285 }
 0x8cf   :  { %v288_v44 = vsel %vm49_vm7, 1e+30, %v286_v43 }
 0x8d0   :  { %v289_v46 = vmin.f32 %v283_v22, %v288_v44  ;;  %v389_v22 = vld [vmem:[%s1224_s2 + $0x34] sm:$0x1] }
 0x8d1   :  { %v409_v26 = vrot.slane %v389_v22, 2 }
 0x8d2   :  { %291 = vrot.lane.b32.xlu1 %v289_v46, %s738_s14 }
 0x8d3   :  { %v410_v32 = vsel %vm91_vm8, %v409_v26, %v408_v27 }
 0x8d4   :  { %v412_v33 = vsel %vm94_vm9, %v411_v30, %v410_v32 }
 0x8d6   :  { %334 = vrot.lane.b32.xlu1 %v333_v48, %s734_s20  ;;  %v743_v48 = vmov 5  }
 0x8df   :  { %v346_v54 = vpop.permute.xlu0 %345 }
 0x944   :  { %v292_v49 = vpop.permute.xlu1 %291 }
 0x945   :  { %v294_v50 = vsel %vm56_vm10, 1e+30, %v292_v49 }
 0x946   :  { %v295_v51 = vmin.f32 %v289_v46, %v294_v50 }
 0x948   :  { %v978_v52 = vadd.f32 %v295_v51, %v828_v38  ;;  %v335_v53 = vpop.permute.xlu1 %334 }
 0x949   :  { %v337_v56 = vsel %vm30_vm0, 1e+30, %v335_v53 }
 0x94a   :  { %339 = vrot.lane.b32.xlu1 %v978_v52, %s734_s20  ;;  %v348_v58 = vadd.f32 %v346_v54, %v978_v52 }
 0x9bc   :  { %v340_v55 = vpop.permute.xlu1 %339 }
 0x9bd   :  { %v342_v57 = vsel %vm30_vm0, 1e+30, %v340_v55 }
 0x9be   :  { %v343_v59 = vadd.f32 %v342_v57, %v337_v56  ;;  %v463_v56 = vld [vmem:[%s1224_s2 + $0xd] sm:$0x1]  ;;  %v464_v57 = vld [vmem:[%s1224_s2 + $0x15] sm:$0x1] }
 0x9c0   :  { %v349_v60 = vmin.f32 %v343_v59, %v348_v58  ;;  %v478_v58 = vrot.slane %v463_v56, 7  ;;  %v462_v59 = vld [vmem:[%s1224_s2 + $0x5] sm:$0x1] }
 0x9c2   :  { %v350_v61 = vsub.f32 %v349_v60, %v828_v38  ;;  %v465_v60 = vld [vmem:[%s1224_s2 + $0x1d] sm:$0x1]  ;;  %v479_v62 = vsel %vm76_vm2, %v478_v58, %v462_v59 }
 0x9c4   :  { %352 = vrot.lane.b32.xlu0 %v350_v61, %s734_s20 }
 0xa36   :  { %v353_v63 = vpop.permute.xlu0 %352 }
 0xa37   :  { %v355_v0 = vsel %vm30_vm0, 1e+30, %v353_v63  ;;  %v466_v63 = vld [vmem:[%s1224_s2 + $0x25] sm:$0x1] }
 0xa38   :  { %v356_v1 = vmin.f32 %v350_v61, %v355_v0  ;;  %v480_v61 = vrot.slane %v464_v57, 6  ;;  %v482_v0 = vrot.slane %v465_v60, 5  ;;  %v547_v57 = vld [vmem:[%s1224_s2 + $0x36] sm:$0x1]  ;;  %v548_v60 = vld [vmem:[%s1224_s2 + $0x3e] sm:$0x1] }
 0xa3a   :  { %358 = vrot.lane.b32.xlu1 %v356_v1, %s736_s21 }
 0xaac   :  { %v359_v2 = vpop.permute.xlu1 %358 }
 0xaad   :  { %v361_v5 = vsel %vm42_vm1, 1e+30, %v359_v2  ;;  %v467_v2 = vld [vmem:[%s1224_s2 + $0x2d] sm:$0x1] }
 0xaae   :  { %v362_v6 = vmin.f32 %v356_v1, %v361_v5  ;;  %v481_v1 = vsel %vm79_vm3, %v480_v61, %v479_v62  ;;  %v484_v5 = vrot.slane %v466_v63, 4  ;;  %v486_v8 = vrot.slane %v467_v2, 3 }
 0xaaf   :  { %v567_v61 = vrot.slane %v547_v57, 2 }
 0xab0   :  { %364 = vrot.lane.b32.xlu0 %v362_v6, %s737_s3 }
 0xab4   :  { %424 = vperm.xlu0 %729, %v790_v10  }
 0xab8   :  { %730 = vset.pattern.permute.xlu0 %v743_v48 }
 0xb22   :  { %v365_v28 = vpop.permute.xlu0 %364 }
 0xb23   :  { %v367_v29 = vsel %vm49_vm7, 1e+30, %v365_v28 }
 0xb24   :  { %v368_v31 = vmin.f32 %v362_v6, %v367_v29  ;;  %v483_v6 = vsel %vm82_vm4, %v482_v0, %v481_v1  ;;  %v569_v1 = vrot.slane %v548_v60, 1 }
 0xb25   :  { %v485_v9 = vsel %vm85_vm5, %v484_v5, %v483_v6 }
 0xb26   :  { %370 = vrot.lane.b32.xlu1 %v368_v31, %s738_s14  ;;  %v487_v13 = vsel %vm88_vm6, %v486_v8, %v485_v9 }
 0xb27   :  { %v489_v18 = vsel %vm91_vm8, %v488_v12, %v487_v13 }
 0xb28   :  { %v491_v19 = vsel %vm94_vm9, %v490_v16, %v489_v18 }
 0xb2a   :  { %413 = vrot.lane.b32.xlu1 %v412_v33, %s734_s20 }
 0xb33   :  { %v425_v40 = vpop.permute.xlu0 %424 }
 0xb98   :  { %v371_v34 = vpop.permute.xlu1 %370 }
 0xb99   :  { %v373_v35 = vsel %vm56_vm10, 1e+30, %v371_v34  ;;  %v744_v34 = vmov 6  }
 0xb9a   :  { %v374_v36 = vmin.f32 %v368_v31, %v373_v35 }
 0xb9c   :  { %v1028_v37 = vadd.f32 %v374_v36, %v828_v38  ;;  %v414_v39 = vpop.permute.xlu1 %413 }
 0xb9d   :  { %v416_v42 = vsel %vm30_vm0, 1e+30, %v414_v39 }
 0xb9e   :  { %418 = vrot.lane.b32.xlu1 %v1028_v37, %s734_s20  ;;  %v427_v44 = vadd.f32 %v425_v40, %v1028_v37 }
 0xc10   :  { %v419_v41 = vpop.permute.xlu1 %418 }
 0xc11   :  { %v421_v43 = vsel %vm30_vm0, 1e+30, %v419_v41 }
 0xc12   :  { %v422_v45 = vadd.f32 %v421_v43, %v416_v42  ;;  %v542_v43 = vld [vmem:[%s1224_s2 + $0xe] sm:$0x1] }
 0xc14   :  { %v428_v46 = vmin.f32 %v422_v45, %v427_v44  ;;  %v543_v44 = vld [vmem:[%s1224_s2 + $0x16] sm:$0x1]  ;;  %v557_v45 = vrot.slane %v542_v43, 7 }
 0xc15   :  { %v559_v48 = vrot.slane %v543_v44, 6  ;;  %v626_v44 = vld [vmem:[%s1224_s2 + $0x37] sm:$0x1] }
 0xc16   :  { %v429_v47 = vsub.f32 %v428_v46, %v828_v38  ;;  %v541_v46 = vld [vmem:[%s1224_s2 + $0x6] sm:$0x1] }
 0xc18   :  { %431 = vrot.lane.b32.xlu0 %v429_v47, %s734_s20 }
 0xc8a   :  { %v432_v49 = vpop.permute.xlu0 %431 }
 0xc8b   :  { %v434_v50 = vsel %vm30_vm0, 1e+30, %v432_v49  ;;  %v558_v49 = vsel %vm76_vm2, %v557_v45, %v541_v46 }
 0xc8c   :  { %v435_v51 = vmin.f32 %v429_v47, %v434_v50  ;;  %v544_v47 = vld [vmem:[%s1224_s2 + $0x1e] sm:$0x1]  ;;  %v545_v50 = vld [vmem:[%s1224_s2 + $0x26] sm:$0x1] }
 0xc8e   :  { %437 = vrot.lane.b32.xlu1 %v435_v51, %s736_s21 }
 0xd00   :  { %v438_v53 = vpop.permute.xlu1 %437 }
 0xd01   :  { %v440_v54 = vsel %vm42_vm1, 1e+30, %v438_v53  ;;  %v560_v53 = vsel %vm79_vm3, %v559_v48, %v558_v49  ;;  %v646_v48 = vrot.slane %v626_v44, 2 }
 0xd02   :  { %v441_v55 = vmin.f32 %v435_v51, %v440_v54  ;;  %v561_v51 = vrot.slane %v544_v47, 5  ;;  %v546_v54 = vld [vmem:[%s1224_s2 + $0x2e] sm:$0x1]  ;;  %v627_v47 = vld [vmem:[%s1224_s2 + $0x3f] sm:$0x1] }
 0xd03   :  { %v565_v58 = vrot.slane %v546_v54, 3 }
 0xd04   :  { %443 = vrot.lane.b32.xlu0 %v441_v55, %s737_s3  ;;  %v562_v56 = vsel %vm82_vm4, %v561_v51, %v560_v53  ;;  %v648_v53 = vrot.slane %v627_v47, 1 }
 0xd08   :  { %503 = vperm.xlu0 %730, %v790_v10  }
 0xd0c   :  { %731 = vset.pattern.permute.xlu0 %v744_v34  ;;  %v623_v34 = vld [vmem:[%s1224_s2 + $0x1f] sm:$0x1] }
 0xd76   :  { %v444_v14 = vpop.permute.xlu0 %443 }
 0xd77   :  { %v446_v15 = vsel %vm49_vm7, 1e+30, %v444_v14 }
 0xd78   :  { %v447_v17 = vmin.f32 %v441_v55, %v446_v15  ;;  %v563_v55 = vrot.slane %v545_v50, 4 }
 0xd7a   :  { %449 = vrot.lane.b32.xlu1 %v447_v17, %s738_s14  ;;  %v564_v59 = vsel %vm85_vm5, %v563_v55, %v562_v56 }
 0xd7b   :  { %v566_v62 = vsel %vm88_vm6, %v565_v58, %v564_v59 }
 0xd7c   :  { %v568_v5 = vsel %vm91_vm8, %v567_v61, %v566_v62 }
 0xd7d   :  { %v570_v6 = vsel %vm94_vm9, %v569_v1, %v568_v5 }
 0xd7e   :  { %492 = vrot.lane.b32.xlu1 %v491_v19, %s734_s20 }
 0xd87   :  { %v504_v26 = vpop.permute.xlu0 %503 }
 0xdec   :  { %v450_v20 = vpop.permute.xlu1 %449 }
 0xded   :  { %v452_v22 = vsel %vm56_vm10, 1e+30, %v450_v20 }
 0xdee   :  { %v453_v23 = vmin.f32 %v447_v17, %v452_v22  ;;  %v745_v22 = vmov 7  }
 0xdf0   :  { %v1078_v24 = vadd.f32 %v453_v23, %v828_v38  ;;  %v493_v25 = vpop.permute.xlu1 %492 }
 0xdf1   :  { %v495_v28 = vsel %vm30_vm0, 1e+30, %v493_v25 }
 0xdf2   :  { %497 = vrot.lane.b32.xlu1 %v1078_v24, %s734_s20  ;;  %v506_v30 = vadd.f32 %v504_v26, %v1078_v24 }
 0xe64   :  { %v498_v27 = vpop.permute.xlu1 %497 }
 0xe65   :  { %v500_v29 = vsel %vm30_vm0, 1e+30, %v498_v27 }
 0xe66   :  { %v501_v31 = vadd.f32 %v500_v29, %v495_v28 }
 0xe68   :  { %v507_v32 = vmin.f32 %v501_v31, %v506_v30  ;;  %v621_v30 = vld [vmem:[%s1224_s2 + $0xf] sm:$0x1]  ;;  %v622_v31 = vld [vmem:[%s1224_s2 + $0x17] sm:$0x1] }
 0xe6a   :  { %v508_v33 = vsub.f32 %v507_v32, %v828_v38  ;;  %v636_v32 = vrot.slane %v621_v30, 7 }
 0xe6c   :  { %510 = vrot.lane.b32.xlu0 %v508_v33, %s734_s20 }
 0xede   :  { %v511_v35 = vpop.permute.xlu0 %510 }
 0xedf   :  { %v513_v36 = vsel %vm30_vm0, 1e+30, %v511_v35 }
 0xee0   :  { %v514_v39 = vmin.f32 %v508_v33, %v513_v36  ;;  %v620_v33 = vld [vmem:[%s1224_s2 + $0x7] sm:$0x1] }
 0xee1   :  { %v637_v35 = vsel %vm76_vm2, %v636_v32, %v620_v33  ;;  %v624_v36 = vld [vmem:[%s1224_s2 + $0x27] sm:$0x1] }
 0xee2   :  { %516 = vrot.lane.b32.xlu1 %v514_v39, %s736_s21 }
 0xf54   :  { %v517_v40 = vpop.permute.xlu1 %516 }
 0xf55   :  { %v519_v41 = vsel %vm42_vm1, 1e+30, %v517_v40 }
 0xf56   :  { %v520_v42 = vmin.f32 %v514_v39, %v519_v41  ;;  %v640_v39 = vrot.slane %v623_v34, 5  ;;  %v625_v41 = vld [vmem:[%s1224_s2 + $0x2f] sm:$0x1] }
 0xf57   :  { %v644_v45 = vrot.slane %v625_v41, 3 }
 0xf58   :  { %522 = vrot.lane.b32.xlu0 %v520_v42, %s737_s3 }
 0xf5c   :  { %582 = vperm.xlu0 %731, %v790_v10  }
 0xf60   :  { %732 = vset.pattern.permute.xlu0 %v745_v22 }
 0xfca   :  { %v523_v63 = vpop.permute.xlu0 %522 }
 0xfcb   :  { %v525_v0 = vsel %vm49_vm7, 1e+30, %v523_v63 }
 0xfcc   :  { %v526_v2 = vmin.f32 %v520_v42, %v525_v0  ;;  %v642_v42 = vrot.slane %v624_v36, 4 }
 0xfce   :  { %528 = vrot.lane.b32.xlu1 %v526_v2, %s738_s14 }
 0xfd2   :  { %571 = vrot.lane.b32.xlu1 %v570_v6, %s734_s20 }
 0xfdb   :  { %v583_v13 = vpop.permute.xlu0 %582 }
0x1040   :  { %v529_v7 = vpop.permute.xlu1 %528 }
0x1041   :  { %v531_v8 = vsel %vm56_vm10, 1e+30, %v529_v7 }
0x1042   :  { %v532_v9 = vmin.f32 %v526_v2, %v531_v8  ;;  %v20_v8 = vld [vmem:[%s1225_s0] sm:$0xff] }
0x1043   :  { %vm139_vm11 = vcmp.eq.s32.totalorder %v20_v8, 1  ;;  %vm297_vm12 = vcmp.eq.s32.totalorder %v20_v8, 3  ;;  %vm376_vm13 = vcmp.eq.s32.totalorder %v20_v8, 4  ;;  %vm534_vm14 = vcmp.eq.s32.totalorder %v20_v8, 6 }
0x1044   :  { %v1128_v11 = vadd.f32 %v532_v9, %v828_v38  ;;  %v572_v12 = vpop.permute.xlu1 %571  ;;  %vm692_vm15 = vcmp.eq.s32.totalorder %v20_v8, 8  ;;  %vm218_vm2 = vcmp.eq.s32.totalorder %v20_v8, 2 }
0x1045   :  { %v574_v15 = vsel %vm30_vm0, 1e+30, %v572_v12 }
0x1046   :  { %576 = vrot.lane.b32.xlu1 %v1128_v11, %s734_s20  ;;  %v585_v17 = vadd.f32 %v583_v13, %v1128_v11 }
0x10b8   :  { %v577_v14 = vpop.permute.xlu1 %576 }
0x10b9   :  { %v579_v16 = vsel %vm30_vm0, 1e+30, %v577_v14  ;;  %v140_v14 = vsel %vm139_vm11, 1, %v735_v3 }
0x10ba   :  { %v580_v18 = vadd.f32 %v579_v16, %v574_v15  ;;  %v298_v15 = vsel %vm297_vm12, 1, %v735_v3  ;;  %v377_v16 = vsel %vm376_vm13, 1, %v735_v3  ;;  %vm704_vm13 = vcmask 72704  }
0x10bc   :  { %v586_v19 = vmin.f32 %v580_v18, %v585_v17  ;;  %v535_v17 = vsel %vm534_vm14, 1, %v735_v3  ;;  %v693_v18 = vsel %vm692_vm15, 1, %v735_v3 }
0x10be   :  { %v587_v20 = vsub.f32 %v586_v19, %v828_v38 }
0x10c0   :  { %589 = vrot.lane.b32.xlu0 %v587_v20, %s734_s20 }
0x1132   :  { %v590_v23 = vpop.permute.xlu0 %589 }
0x1133   :  { %v592_v25 = vsel %vm30_vm0, 1e+30, %v590_v23  ;;  %v219_v23 = vsel %vm218_vm2, 1, %v735_v3 }
0x1134   :  { %v593_v26 = vmin.f32 %v587_v20, %v592_v25 }
0x1136   :  { %595 = vrot.lane.b32.xlu1 %v593_v26, %s736_s21 }
0x11a8   :  { %v596_v27 = vpop.permute.xlu1 %595 }
0x11a9   :  { %v598_v28 = vsel %vm42_vm1, 1e+30, %v596_v27  ;;  %v21_v27 = vld [vmem:[%s1226_s1] sm:$0xff] }
0x11aa   :  { %v599_v29 = vmin.f32 %v593_v26, %v598_v28 }
0x11ac   :  { %601 = vrot.lane.b32.xlu0 %v599_v29, %s737_s3 }
0x11b0   :  { %661 = vperm.xlu0 %732, %v790_v10   ;;  %v638_v10 = vrot.slane %v622_v31, 6 }
0x11b2   :  { %v639_v40 = vsel %vm79_vm3, %v638_v10, %v637_v35  ;;  %vm455_vm3 = vcmp.eq.s32.totalorder %v20_v8, 5 }
0x11b3   :  { %v641_v43 = vsel %vm82_vm4, %v640_v39, %v639_v40  ;;  %v456_v25 = vsel %vm455_vm3, 1, %v735_v3  ;;  %vm613_vm4 = vcmp.eq.s32.totalorder %v20_v8, 7 }
0x11b4   :  { %733 = vset.pattern.permute.xlu0 %v735_v3  ;;  %v643_v46 = vsel %vm85_vm5, %v642_v42, %v641_v43  ;;  %v614_v26 = vsel %vm613_vm4, 1, %v735_v3  ;;  %v24_v42 = vlaneseq }
0x11b5   :  { %v645_v49 = vsel %vm88_vm6, %v644_v45, %v643_v46 }
0x11b6   :  { %v647_v55 = vsel %vm91_vm8, %v646_v48, %v645_v49 }
0x11b7   :  { %v649_v56 = vsel %vm94_vm9, %v648_v53, %v647_v55 }
0x121e   :  { %v602_v50 = vpop.permute.xlu0 %601 }
0x121f   :  { %v604_v51 = vsel %vm49_vm7, 1e+30, %v602_v50 }
0x1220   :  { %v605_v54 = vmin.f32 %v599_v29, %v604_v51 }
0x1222   :  { %607 = vrot.lane.b32.xlu1 %v605_v54, %s738_s14 }
0x1226   :  { %650 = vrot.lane.b32.xlu1 %v649_v56, %s734_s20 }
0x122f   :  { %v662_v62 = vpop.permute.xlu0 %661 }
0x1294   :  { %v608_v57 = vpop.permute.xlu1 %607 }
0x1295   :  { %v610_v58 = vsel %vm56_vm10, 1e+30, %v608_v57 }
0x1296   :  { %v611_v59 = vmin.f32 %v605_v54, %v610_v58 }
0x1298   :  { %v1179_v60 = vadd.f32 %v611_v59, %v828_v38  ;;  %v651_v61 = vpop.permute.xlu1 %650 }
0x1299   :  { %v653_v0 = vsel %vm30_vm0, 1e+30, %v651_v61 }
0x129a   :  { %655 = vrot.lane.b32.xlu1 %v1179_v60, %s734_s20  ;;  %v664_v2 = vadd.f32 %v662_v62, %v1179_v60 }
0x130c   :  { %v656_v63 = vpop.permute.xlu1 %655 }
0x130d   :  { %v658_v1 = vsel %vm30_vm0, 1e+30, %v656_v63 }
0x130e   :  { %v659_v5 = vadd.f32 %v658_v1, %v653_v0 }
0x1310   :  { %v665_v6 = vmin.f32 %v659_v5, %v664_v2 }
0x1312   :  { %v666_v7 = vsub.f32 %v665_v6, %v828_v38 }
0x1314   :  { %668 = vrot.lane.b32.xlu0 %v666_v7, %s734_s20 }
0x1386   :  { %v669_v9 = vpop.permute.xlu0 %668 }
0x1387   :  { %v671_v12 = vsel %vm30_vm0, 1e+30, %v669_v9 }
0x1388   :  { %v672_v13 = vmin.f32 %v666_v7, %v671_v12 }
0x138a   :  { %674 = vrot.lane.b32.xlu1 %v672_v13, %s736_s21 }
0x138e   :  { %142 = vperm.xlu1 %725, %v140_v14  }
0x1392   :  { %300 = vperm.xlu1 %725, %v298_v15  }
0x1396   :  { %379 = vperm.xlu1 %725, %v377_v16  }
0x139a   :  { %537 = vperm.xlu1 %725, %v535_v17  }
0x139e   :  { %695 = vperm.xlu1 %725, %v693_v18  }
0x13fc   :  { %v675_v19 = vpop.permute.xlu1 %674 }
0x13fd   :  { %v677_v20 = vsel %vm42_vm1, 1e+30, %v675_v19 }
0x13fe   :  { %v678_v22 = vmin.f32 %v672_v13, %v677_v20 }
0x1400   :  { %680 = vrot.lane.b32.xlu0 %v678_v22, %s737_s3 }
0x1404   :  { %221 = vperm.xlu0 %733, %v219_v23  }
0x1408   :  { %458 = vperm.xlu0 %733, %v456_v25  }
0x140c   :  { %616 = vperm.xlu0 %733, %v614_v26  }
0x140d   :  { %v143_v31 = vpop.permute.xlu1 %142 }
0x140e   :  { %vm144_vm1 = vcmp.eq.s32.totalorder %v143_v31, 1 }
0x140f   :  { %v145_v3 = vsel %vm144_vm1, %v878_v21, %v828_v38  ;;  %v25_v21 = vand.u32 127, %v24_v42 }
0x1410   :  { %700 = vperm.xlu0 %733, %v21_v27  }
0x1411   :  { %v301_v32 = vpop.permute.xlu1 %300 }
0x1412   :  { %vm302_vm6 = vcmp.eq.s32.totalorder %v301_v32, 1 }
0x1415   :  { %v380_v33 = vpop.permute.xlu1 %379 }
0x1419   :  { %v538_v10 = vpop.permute.xlu1 %537 }
0x141a   :  { %vm539_vm11 = vcmp.eq.s32.totalorder %v538_v10, 1 }
0x141d   :  { %v696_v40 = vpop.permute.xlu1 %695 }
0x141e   :  { %vm697_vm12 = vcmp.eq.s32.totalorder %v696_v40, 1 }
0x1472   :  { %v681_v28 = vpop.permute.xlu0 %680 }
0x1473   :  { %v683_v29 = vsel %vm49_vm7, 1e+30, %v681_v28  ;;  %vm381_vm7 = vcmp.eq.s32.totalorder %v380_v33, 1 }
0x1474   :  { %v684_v30 = vmin.f32 %v678_v22, %v683_v29 }
0x1476   :  { %686 = vrot.lane.b32.xlu1 %v684_v30, %s738_s14 }
0x1483   :  { %v222_v34 = vpop.permute.xlu0 %221 }
0x1484   :  { %vm223_vm5 = vcmp.eq.s32.totalorder %v222_v34, 1 }
0x1485   :  { %v224_v35 = vsel %vm223_vm5, %v928_v4, %v145_v3 }
0x1486   :  { %v303_v39 = vsel %vm302_vm6, %v978_v52, %v224_v35 }
0x1487   :  { %v459_v36 = vpop.permute.xlu0 %458  ;;  %v382_v41 = vsel %vm381_vm7, %v1028_v37, %v303_v39 }
0x1488   :  { %vm460_vm8 = vcmp.eq.s32.totalorder %v459_v36, 1 }
0x1489   :  { %v461_v45 = vsel %vm460_vm8, %v1078_v24, %v382_v41 }
0x148a   :  { %v540_v48 = vsel %vm539_vm11, %v1128_v11, %v461_v45 }
0x148b   :  { %v617_v43 = vpop.permute.xlu0 %616 }
0x148c   :  { %vm618_vm9 = vcmp.eq.s32.totalorder %v617_v43, 1 }
0x148d   :  { %v619_v37 = vsel %vm618_vm9, %v1179_v60, %v540_v48 }
0x148f   :  { %v701_v4 = vpop.permute.xlu0 %700 }
0x1490   :  { %vm702_vm14 = vcmp.eq.s32.totalorder %v25_v21, %v701_v4 }
0x14e8   :  { %v687_v44 = vpop.permute.xlu1 %686 }
0x14e9   :  { %v689_v46 = vsel %vm56_vm10, 1e+30, %v687_v44 }
0x14ea   :  { %v690_v47 = vmin.f32 %v684_v30, %v689_v46 }
0x14ec   :  { %v691_v52 = vadd.f32 %v690_v47, %v828_v38 }
0x14ee   :  { %v698_v49 = vsel %vm697_vm12, %v691_v52, %v619_v37 }
0x14ef   :  { %v703_v50 = vsel %vm702_vm14, %v698_v49, 0.0 }
0x14f0   :  { %v705_v51 = vsel %vm704_vm13, %v703_v50, 0.0 }
0x14f1   :  { %706 = vadd.xlane.f32.xlu0 %v705_v51 }
0x157e   :  { %v707_v24 = vpop.xlane.xlu0 %706 }
0x157f   :  { %708 = vst.msk [vmem:[%s1227_s5] sm:$0xff] %vm30_vm0, %v707_v24 }

</bundles_post_ra>
